<compile_context>
chip_gen: v7x
topology: tpu7x:2x2x1
jax: 0.10.0
libtpu: 0.0.40
codegen_flags: <defaults>
</compile_context>

<pallas_src>
import functools

import jax
import jax.numpy as jnp
from jax.experimental import pallas as pl
from jax.experimental.pallas import tpu as pltpu


# --------------------------------------------------------------------------
# Static mask helpers
# --------------------------------------------------------------------------
def _live_taps(kernel_size, blind_center):
    """(kh, kw) positions NOT zeroed by the PixelCNN mask (static)."""
    c = kernel_size // 2
    taps = []
    for kh in range(kernel_size):
        for kw in range(kernel_size):
            if kh < c:
                taps.append((kh, kw))
            elif kh == c and (kw < c or (kw == c and not blind_center)):
                taps.append((kh, kw))
    return taps


def make_pixelcnn_mask(kernel_size, blind_center=False):
    """Identical to the buffer built in MaskedConv2d.__init__ (shape 1,1,K,K)."""
    k = kernel_size
    c = k // 2
    m = jnp.ones((1, 1, k, k), jnp.float32)
    m = m.at[:, :, c, c + (0 if blind_center else 1):].set(0.0)
    m = m.at[:, :, c + 1:, :].set(0.0)
    return m


def _pick_m_tile(m_total, target=1024):
    """Lane-axis tile: multiple of 128, <= target, prefer >= 2 grid steps."""
    tm = max(128, target - target % 128)
    while tm > 128 and pl.cdiv(m_total, tm) < 2:
        tm //= 2
    return tm


# --------------------------------------------------------------------------
# Pallas kernel: one MXU dot per grid step, lane-dense in and out.
# --------------------------------------------------------------------------
def _masked_conv_matmul_kernel(x_ref, w_ref, o_ref):
    """x_ref: (KT*Cin, TM)   operand-dtype im2col tile (lane axis = TM)
       w_ref: (Cout, KT*Cin) packed live-tap weights
       o_ref: (Cout, TM)     f32 output tile (lane axis = TM)
    """
    o_ref[...] = jnp.dot(w_ref[...], x_ref[...],
                         preferred_element_type=jnp.float32)


# --------------------------------------------------------------------------
# Wrapper: im2col over live taps, pallas_call, unpack to NCHW.
# --------------------------------------------------------------------------
@functools.partial(jax.jit,
                   static_argnames=("blind_center", "m_tile", "operand_dtype"))
def masked_conv2d(x_nchw, weight_oihw, *, blind_center=False, m_tile=None,
                  operand_dtype=jnp.bfloat16):
    """Forward pass of MaskedConv2d.

    x_nchw:      (N, Cin, H, W)
    weight_oihw: (Cout, Cin, K, K)  (nn.Conv2d weight, bias=False)
    returns:     (N, Cout, H, W) float32
    """
    N, Cin, H, W = x_nchw.shape
    Cout, _, K, _ = weight_oihw.shape
    p = K // 2

    taps = _live_taps(K, blind_center)
    if not taps:  # K == 1 with blind_center: everything masked -> zeros
        return jnp.zeros((N, Cout, H, W), jnp.float32)
    KT = len(taps)

    # "weight.data *= mask" == keep only the live taps.
    # Pack to (Cout, KT*Cin); column order is (tap-major, cin-minor) to match
    # the im2col row order below.
    w_mat = jnp.concatenate(
        [weight_oihw[:, :, kh, kw] for (kh, kw) in taps], axis=1
    ).astype(operand_dtype)                                  # (Cout, KT*Cin)

    # Transposed live-tap im2col: (KT*Cin, N*H*W).
    # NCHW -> CNHW once so the per-tap shifted slices stack directly into the
    # (tap, cin) row order with no post-stack transpose.
    x_cnhw = jnp.transpose(x_nchw, (1, 0, 2, 3)).astype(operand_dtype)
    x_pad = jnp.pad(x_cnhw, ((0, 0), (0, 0), (p, p), (p, p)))  # pad = K//2
    x_colT = jnp.stack(
        [x_pad[:, :, kh:kh + H, kw:kw + W] for (kh, kw) in taps], axis=0
    )                                                        # (KT, Cin, N, H, W)
    x_colT = x_colT.reshape(KT * Cin, N * H * W)

    # Tile the flattened (batch*height*width) axis; pad to a 128-multiple tile.
    M = N * H * W
    TM = m_tile if m_tile is not None else _pick_m_tile(M)
    assert TM % 128 == 0, "lane tile must be a multiple of 128"
    nT = pl.cdiv(M, TM)
    Mp = nT * TM
    if Mp != M:
        x_colT = jnp.pad(x_colT, ((0, 0), (0, Mp - M)))

    out = pl.pallas_call(
        _masked_conv_matmul_kernel,
        out_shape=jax.ShapeDtypeStruct((Cout, Mp), jnp.float32),
        grid_spec=pltpu.PrefetchScalarGridSpec(
            num_scalar_prefetch=0,
            grid=(nT,),                           # single collapsed axis
            in_specs=[
                pl.BlockSpec((KT * Cin, TM), lambda i: (0, i)),
                pl.BlockSpec((Cout, KT * Cin), lambda i: (0, 0)),
            ],
            out_specs=pl.BlockSpec((Cout, TM), lambda i: (0, i)),
        ),
        compiler_params=pltpu.CompilerParams(
            dimension_semantics=("parallel",)),
    )(x_colT, w_mat)

    # Unpack lane-dense (Cout, N*H*W) back to NCHW in the XLA epilogue.
    y = out[:, :M].reshape(Cout, N, H, W)
    return jnp.transpose(y, (1, 0, 2, 3))


# --------------------------------------------------------------------------
# Reference (pure XLA) for verification.
# --------------------------------------------------------------------------
def masked_conv2d_ref(x_nchw, weight_oihw, mask):
    K = weight_oihw.shape[-1]
    p = K // 2
    w = weight_oihw * mask
    return jax.lax.conv_general_dilated(
        x_nchw.astype(jnp.float32), w.astype(jnp.float32),
        window_strides=(1, 1), padding=((p, p), (p, p)),
        dimension_numbers=("NCHW", "OIHW", "NCHW"))


if __name__ == "__main__":
    # Small deterministic example: batch=2, in_channels=4, out_channels=8,
    # spatial 16x16, kernel_size=3.
    N, Cin, Cout, H, W, K = 2, 4, 8, 16, 16, 3

    key = jax.random.PRNGKey(0)
    kx, kw = jax.random.split(key)
    x = jax.random.normal(kx, (N, Cin, H, W), dtype=jnp.float32)

    # Deterministic init matching nn.Conv2d's kaiming_uniform(a=sqrt(5)) scale.
    bound = 1.0 / jnp.sqrt(jnp.float32(Cin * K * K))
    weight = jax.random.uniform(kw, (Cout, Cin, K, K), dtype=jnp.float32,
                                minval=-bound, maxval=bound)

    for blind in (False, True):   # PixelCNN mask "B" and mask "A"
        y = jax.block_until_ready(masked_conv2d(x, weight, blind_center=blind))
        mask = make_pixelcnn_mask(K, blind_center=blind)
        y_ref = jax.block_until_ready(masked_conv2d_ref(x, weight, mask))
        assert y.shape == (N, Cout, H, W)
        # bf16 MXU operands with f32 accumulation -> loose-but-discriminating tol.
        assert jnp.allclose(y, y_ref, atol=2e-2, rtol=2e-2), \
            f"mismatch vs XLA conv (blind_center={blind})"

    # f32-operand path (flagged in review for tighter parity with nn.Conv2d).
    y32 = jax.block_until_ready(
        masked_conv2d(x, weight, blind_center=False,
                      operand_dtype=jnp.float32))
    mask = make_pixelcnn_mask(K, blind_center=False)
    y_ref = jax.block_until_ready(masked_conv2d_ref(x, weight, mask))
    assert jnp.allclose(y32, y_ref, atol=2e-2, rtol=2e-2), \
        "mismatch vs XLA conv (f32 operands)"

    print("KERNEL_OK")
</pallas_src>

<mosaic_0001>
module attributes {stable_mosaic.version = 11 : i64} {
  func.func @_masked_conv_matmul_kernel(%arg0: i32, %arg1: memref<20x256xbf16, #tpu.memory_space<vmem>>, %arg2: memref<8x20xbf16, #tpu.memory_space<vmem>>, %arg3: memref<8x256xf32, #tpu.memory_space<vmem>>) attributes {dimension_semantics = [#tpu.dimension_semantics<parallel>], iteration_bounds = array<i64: 2>, scalar_prefetch = 0 : i64, scratch_operands = 0 : i64, tpu.core_type = #tpu.core_type<tc>, window_params = [{transform_indices = @transform_0, window_bounds = array<i64: 20, 256>}, {pipeline_mode = #tpu.pipeline_mode<synchronous>, transform_indices = @transform_1, window_bounds = array<i64: 8, 20>}, {transform_indices = @transform_2, window_bounds = array<i64: 8, 256>}]} {
    %c0 = arith.constant 0 : index
    %c0_0 = arith.constant 0 : index
    %0 = vector.load %arg2[%c0, %c0_0] : memref<8x20xbf16, #tpu.memory_space<vmem>>, vector<8x20xbf16>
    %c0_1 = arith.constant 0 : index
    %c0_2 = arith.constant 0 : index
    %1 = vector.load %arg1[%c0_1, %c0_2] : memref<20x256xbf16, #tpu.memory_space<vmem>>, vector<20x256xbf16>
    %cst = arith.constant dense<0.000000e+00> : vector<8x256xf32>
    %2 = tpu.matmul %0, %1, %cst {dimension_numbers = #tpu.dot_dimension_numbers<[1], [0], [0], [1], [0, 0, 1, 1], [], []>} : vector<8x20xbf16>, vector<20x256xbf16>, vector<8x256xf32> -> vector<8x256xf32>
    %c0_3 = arith.constant 0 : index
    %c0_4 = arith.constant 0 : index
    %3 = vector.load %arg3[%c0_3, %c0_4] : memref<8x256xf32, #tpu.memory_space<vmem>>, vector<8x256xf32>
    tpu.vector_store %arg3[%c0_3, %c0_4], %2 {strides = array<i32>} : memref<8x256xf32, #tpu.memory_space<vmem>>, vector<8x256xf32>,
    return
  }
  func.func @transform_0(%arg0: i32) -> (i32, i32) {
    %c0_i32 = arith.constant 0 : i32
    %c0_i32_0 = arith.constant 0 : i32
    return %c0_i32, %arg0 : i32, i32
  }
  func.func @transform_1(%arg0: i32) -> (i32, i32) {
    %c0_i32 = arith.constant 0 : i32
    %c0_i32_0 = arith.constant 0 : i32
    %c0_i32_1 = arith.constant 0 : i32
    return %c0_i32, %c0_i32_0 : i32, i32
  }
  func.func @transform_2(%arg0: i32) -> (i32, i32) {
    %c0_i32 = arith.constant 0 : i32
    %c0_i32_0 = arith.constant 0 : i32
    return %c0_i32, %arg0 : i32, i32
  }
}

</mosaic_0001>

<bundles_post_ra>
// kernel: masked_conv2d.1
= control target key start
LH: loop header
LB: loop body
LE: loop exit
PB: predicated region body
PF: predicated region fallthrough
CT: control target
= control target key end

     0   :  { %s415_s9 = smov 0   ;;  %s417_s10 = smov 0   ;;  %s470_s0 = inlined_call_operand.vmem [shape: bf16[20,512], index: 0, kind: input, shape index: {}]   ;;  %s471_s1 = inlined_call_operand.vmem [shape: bf16[8,20], index: 1, kind: input, shape index: {}]   ;;  %s472_s2 = inlined_call_operand.vmem [shape: f32[8,512], index: 2, kind: output, shape index: {}]  }
   0x1   :  { %s419_s11 = smov 0  }
   0x2 LB: > { %s325_s12 = sadd.s32 4294967295, %s397_s11   ;;  %s432_s13 = sadd.s32 1, %s397_s11   ;;  %s397_s11 = sphi %s419_s11, %s475_s11   ;;  %s393_s10 = sphi %s417_s10, %s474_s10   ;;  %s389_s9 = sphi %s415_s9, %s473_s9  }
   0x3   : > { %s16_s14 = ssub.s32 %s397_s11, %s432_s13  ;;  %s19_s15 = sadd.s32 1, %s393_s10 }
   0x4   : > { %p17_p0 = scmp.eq.s32.totalorder %s16_s14, 0  ;;  %p26_p1 = scmp.ne.s32.totalorder %s393_s10, %s389_s9 }
   0x5   : > { %p27_p2 = scmp.eq.s32.totalorder %s397_s11, 0  ;;  %p328_p4 = scmp.ge.s32.totalorder %s397_s11, 2 }
   0x6   : > { %s441_s16 = scalar_select %p17_p0, %s393_s10, %s19_s15  }
   0x7   : > { %p28_p3 = por %p27_p2, %p26_p1  ;;  %102 = sbr.rel (%p328_p4) target bundleno = 21 (0x15), region = 20 }
   0xe   : > { %105 = sbr.rel (!%p28_p3) target bundleno = 21 (0x15), region = 24  ;;  %s107_s17 = sand.u32 (%p28_p3), 1, %s393_s10  }
   0xf   : > { %s342_s18 = sshll.u32 (%p28_p3), %s397_s11, 3  ;;  %s343_s19 = smul.u32 (%p28_p3), 24, %s107_s17 }
  0x10   : > { %s112_s22 = scalar_lea.vmem (%p28_p3), %s470_s0, %s342_s18 }
  0x11   : > { %v144_v0 = vld [vmem:[%s112_s22] sm:$0xff] (%p28_p3)  ;;  %v146_v1 = vld [vmem:[%s112_s22 + $0x10] sm:$0xff] (%p28_p3)  ;;  %s109_s23 = scalar_lea.vmem (%p28_p3), [#allocation2], %s343_s19 }
  0x12   : > { %v148_v2 = vld [vmem:[%s112_s22 + $0x20] sm:$0xff] (%p28_p3)  ;;  %145 = vst [vmem:[%s109_s23] sm:$0xff] (%p28_p3), %v144_v0  ;;  %147 = vst [vmem:[%s109_s23 + $0x8] sm:$0xff] (%p28_p3), %v146_v1 }
  0x13   : > { %149 = vst [vmem:[%s109_s23 + $0x10] sm:$0xff] (%p28_p3), %v148_v2 }
  0x15 PF: > { %p331_p5 = scmp.ge.s32.totalorder %s397_s11, 1  ;;  %p154_p6 = scmp.lt.s32.totalorder %s397_s11, 3 }
  0x17   : > { %p155_p7 = pnand %p331_p5, %p154_p6 }
  0x18   : > { %s161_s24 = sand.u32 (!%p155_p7), 1, %s389_s9   ;;  %v399_v3 = vmov (!%p155_p7), 0   ;;  %vm213_vm0 = vcmask (!%p155_p7), 1041408   ;;  %v190_v10 = vld [vmem:[%s471_s1] sm:$0xf] (!%p155_p7)  ;;  %vm209_vm1 = vcmask (!%p155_p7), 162816  }
  0x19   : > { %158 = sbr.rel (%p155_p7) target bundleno = 253 (0xfd), region = 62  ;;  %252 = vmatprep.mubr.bf16.mxu0 (!%p155_p7), %v399_v3  ;;  %s332_s29 = sshll.u32 (!%p155_p7), %s325_s12, 1 }
  0x1a   : > { %s344_s25 = smul.u32 (!%p155_p7), 24, %s161_s24  ;;  %p184_p8 = scmp.lt.s32.totalorder (!%p155_p7), %s332_s29, 3 }
  0x1c   : > { %s163_s26 = scalar_lea.vmem (!%p155_p7), [#allocation2], %s344_s25 }
  0x1d   : > { %v193_v4 = vld [vmem:[%s163_s26 + $0x10] sm:$0x33] (!%p155_p7)  ;;  %v370_v5 = vld [vmem:[%s163_s26 + $0x4] ss:$8 sps:$4 sm:$0xff] (!%p155_p7)   ;;  %v373_v7 = vld [vmem:[%s163_s26] ss:$8 sps:$4 sm:$0xff] (!%p155_p7)  }
  0x1e   : > { %v337_v6 = vcombine.high (!%p155_p7), %v193_v4, %v193_v4  ;;  %v336_v8 = vcombine.low (!%p155_p7), %v193_v4, %v193_v4  ;;  %220 = vmatprep.subr.bf16.mxu0 (!%p155_p7), %v370_v5 }
  0x1f   : > { %221 = vmatpush1.bf16.msra.mxu0 (!%p155_p7), %v373_v7 }
  0x20   : > { %338 = vmatprep.subr.msk.bf16.mxu0 %vm213_vm0, %v337_v6  ;;  %v215_v9 = vsel %vm213_vm0, %v336_v8, 0  ;;  %s477_s29 = smov (!%p184_p8, %s332_s29), 3 }
  0x21   : > { %s333_s30 = sshll.u32 %s477_s29, 3 }
  0x22   : > { %s187_s5 = scalar_lea.vmem %s472_s2, %s333_s30 }
  0x23   : > { %223 = vmatpush1.bf16.msra.mxu0 %v215_v9 }
  0x26   : > { %339 = vmatmul.mubr.msk.bf16.vlgmr.msra.gmra.mrb[0].mxu0 %vm209_vm1, %v190_v10 }
  0xf9   : > { %v254_v11 = vpop.f32.mrb[0].mxu0 }
  0xfa   : > { %261 = vst [vmem:[%s187_s5] sm:$0xff] %v254_v11  ;;  %v256_v12 = vpop.f32.mrb[1].mxu0 }
  0xfb   : > { %262 = vst [vmem:[%s187_s5 + $0x8] sm:$0xff] %v256_v12  ;;  %v258_v13 = vpop.f32.mrb[2].mxu0 }
  0xfc   : > { %v259_v14 = vpop.f32.mrb[3].mxu0 }
  0xfd PF: > { %p9_p9 = scmp.ge.s32.totalorder %s432_s13, 4   ;;  %s473_s9 = smov %s393_s10 }
  0xfe   : > { %s474_s10 = smov %s441_s16  ;;  %s475_s11 = smov %s432_s13 }
  0xff   :  { %11 = sbr.rel (!%p9_p9) target bundleno = 2 (0x2), region = 101 }

</bundles_post_ra>
